<compile_context>
chip_gen: v6e
topology: v6e:2x2x1
jax: 0.10.0
libtpu: 0.0.40
codegen_flags: <defaults>
</compile_context>

<pallas_src>
import functools

import jax
import jax.numpy as jnp
from jax.experimental import pallas as pl
from jax.experimental.pallas import tpu as pltpu


def actor_kernel(x_ref, w1_ref, b1_ref, w2_ref, b2_ref, wh_ref, bh_ref,
                 out_ref, *, action_dim):
    """Full forward pass for one batch tile (all matmuls + activations on-chip)."""
    x = x_ref[...]

    # Layer 1: Linear + ReLU  (MXU matmul, f32 accumulate)
    h = jnp.dot(x, w1_ref[...], preferred_element_type=jnp.float32) + b1_ref[...]
    h = jnp.maximum(h, 0.0)

    # Layer 2: Linear + ReLU
    h = jnp.dot(h, w2_ref[...], preferred_element_type=jnp.float32) + b2_ref[...]
    h = jnp.maximum(h, 0.0)

    # Fused heads: one matmul producing [tile_b, 2A] = [mean_pre | var_pre].
    z = jnp.dot(h, wh_ref[...], preferred_element_type=jnp.float32) + bh_ref[...]

    # Elementwise select between tanh (first A columns) and numerically stable
    # softplus (last A columns).  Computing both everywhere is cheap VPU/EUP
    # work and avoids cross-lane slicing/concat inside the kernel.
    mean_all = jnp.tanh(z)
    var_all = jnp.maximum(z, 0.0) + jnp.log1p(jnp.exp(-jnp.abs(z)))
    col = jax.lax.broadcasted_iota(jnp.int32, z.shape, 1)
    out_ref[...] = jnp.where(col < action_dim, mean_all, var_all)


def _round_up(x, m):
    return ((x + m - 1) // m) * m


def _auto_block_b(B):
    """Pick a batch tile: big enough to amortise per-step overhead, but keep
    >= 2 grid steps when B allows (v7x has 2 TensorCores per chip)."""
    if B <= 8:
        return B
    Bp = _round_up(B, 8)
    target = max(8, min(512, _round_up(pl.cdiv(Bp, 2), 8)))
    return min(target, Bp)


@functools.partial(jax.jit, static_argnames=("block_b",))
def actor_forward(state, params, *, block_b=None):
    """state: [B, state_dim] f32.  Returns (mean [B, A], variance [B, A])."""
    w1, b1, w2, b2, wm, bm, wv, bv = params
    B, S = state.shape
    H = w1.shape[1]
    A = wm.shape[1]

    if block_b is None:
        block_b = _auto_block_b(B)
    block_b = min(block_b, _round_up(B, 8))

    # Fuse the two heads into a single [H, 2A] weight / [1, 2A] bias.
    wh = jnp.concatenate([wm, wv], axis=1)
    bh = jnp.concatenate([bm, bv], axis=1)

    grid = (pl.cdiv(B, block_b),)

    # Weights/biases are small: replicate full tensors to every grid step
    # (constant index_map => Pallas skips the re-DMA after the first step).
    def rep(shape):
        return pl.BlockSpec(shape, lambda i: tuple(0 for _ in shape))

    out = pl.pallas_call(
        functools.partial(actor_kernel, action_dim=A),
        out_shape=jax.ShapeDtypeStruct((B, 2 * A), jnp.float32),
        grid_spec=pltpu.PrefetchScalarGridSpec(
            num_scalar_prefetch=0,
            grid=grid,
            in_specs=[
                pl.BlockSpec((block_b, S), lambda i: (i, 0)),  # state tile
                rep((S, H)), rep((1, H)),                      # layer 1
                rep((H, H)), rep((1, H)),                      # layer 2
                rep((H, 2 * A)), rep((1, 2 * A)),              # fused heads
            ],
            out_specs=pl.BlockSpec((block_b, 2 * A), lambda i: (i, 0)),
        ),
        compiler_params=pltpu.CompilerParams(
            dimension_semantics=("parallel",)),
    )(state, w1, b1, w2, b2, wh, bh)

    mean = out[:, :A]
    var = out[:, A:]
    return mean, var


def init_params(key, state_dim, hidden_dim, action_dim):
    """Deterministic PyTorch-Linear-style init: U(-1/sqrt(fan_in), 1/sqrt(fan_in))."""
    def linear(key, fan_in, fan_out):
        kw, kb = jax.random.split(key)
        bound = 1.0 / jnp.sqrt(fan_in)
        w = jax.random.uniform(kw, (fan_in, fan_out), jnp.float32, -bound, bound)
        b = jax.random.uniform(kb, (1, fan_out), jnp.float32, -bound, bound)
        return w, b

    k1, k2, k3, k4 = jax.random.split(key, 4)
    w1, b1 = linear(k1, state_dim, hidden_dim)
    w2, b2 = linear(k2, hidden_dim, hidden_dim)
    wm, bm = linear(k3, hidden_dim, action_dim)
    wv, bv = linear(k4, hidden_dim, action_dim)
    return (w1, b1, w2, b2, wm, bm, wv, bv)


def actor_reference(state, params):
    """Pure-JAX reference of the PyTorch forward, for correctness checking."""
    w1, b1, w2, b2, wm, bm, wv, bv = params
    h = jnp.maximum(state @ w1 + b1, 0.0)
    h = jnp.maximum(h @ w2 + b2, 0.0)
    mean = jnp.tanh(h @ wm + bm)
    var = jax.nn.softplus(h @ wv + bv)
    return mean, var


if __name__ == "__main__":
    # Small, deterministic shapes.  B=16 exercises a 2-step grid (block_b=8)
    # so both the weight replication and the "parallel" batch axis are tested.
    B, STATE_DIM, HIDDEN_DIM, ACTION_DIM = 16, 16, 32, 4

    key = jax.random.PRNGKey(0)
    k_params, k_state = jax.random.split(key)

    params = init_params(k_params, STATE_DIM, HIDDEN_DIM, ACTION_DIM)
    state = jax.random.normal(k_state, (B, STATE_DIM), jnp.float32)

    mean, var = actor_forward(state, params)
    jax.block_until_ready((mean, var))

    mean_ref, var_ref = actor_reference(state, params)
    assert mean.shape == (B, ACTION_DIM) and var.shape == (B, ACTION_DIM)
    assert jnp.allclose(mean, mean_ref, atol=2e-5, rtol=2e-5)
    assert jnp.allclose(var, var_ref, atol=2e-5, rtol=2e-5)
    assert bool(jnp.all(var > 0.0))  # softplus output is strictly positive

    # TODO(synk): optimizer (Adam) / training step is not part of the forward
    # pass and is intentionally not translated.

    print("KERNEL_OK")
</pallas_src>

<mosaic_0001>
module attributes {stable_mosaic.version = 11 : i64} {
  func.func @actor_kernel(%arg0: i32, %arg1: memref<8x16xf32, #tpu.memory_space<vmem>>, %arg2: memref<16x32xf32, #tpu.memory_space<vmem>>, %arg3: memref<1x32xf32, #tpu.memory_space<vmem>>, %arg4: memref<32x32xf32, #tpu.memory_space<vmem>>, %arg5: memref<1x32xf32, #tpu.memory_space<vmem>>, %arg6: memref<32x8xf32, #tpu.memory_space<vmem>>, %arg7: memref<1x8xf32, #tpu.memory_space<vmem>>, %arg8: memref<8x8xf32, #tpu.memory_space<vmem>>) attributes {dimension_semantics = [#tpu.dimension_semantics<parallel>], iteration_bounds = array<i64: 2>, scalar_prefetch = 0 : i64, scratch_operands = 0 : i64, tpu.core_type = #tpu.core_type<tc>, window_params = [{transform_indices = @transform_0, window_bounds = array<i64: 8, 16>}, {pipeline_mode = #tpu.pipeline_mode<synchronous>, transform_indices = @transform_1, window_bounds = array<i64: 16, 32>}, {pipeline_mode = #tpu.pipeline_mode<synchronous>, transform_indices = @transform_2, window_bounds = array<i64: 1, 32>}, {pipeline_mode = #tpu.pipeline_mode<synchronous>, transform_indices = @transform_3, window_bounds = array<i64: 32, 32>}, {pipeline_mode = #tpu.pipeline_mode<synchronous>, transform_indices = @transform_4, window_bounds = array<i64: 1, 32>}, {pipeline_mode = #tpu.pipeline_mode<synchronous>, transform_indices = @transform_5, window_bounds = array<i64: 32, 8>}, {pipeline_mode = #tpu.pipeline_mode<synchronous>, transform_indices = @transform_6, window_bounds = array<i64: 1, 8>}, {transform_indices = @transform_7, window_bounds = array<i64: 8, 8>}]} {
    %c0 = arith.constant 0 : index
    %c0_0 = arith.constant 0 : index
    %0 = vector.load %arg1[%c0, %c0_0] : memref<8x16xf32, #tpu.memory_space<vmem>>, vector<8x16xf32>
    %c0_1 = arith.constant 0 : index
    %c0_2 = arith.constant 0 : index
    %1 = vector.load %arg2[%c0_1, %c0_2] : memref<16x32xf32, #tpu.memory_space<vmem>>, vector<16x32xf32>
    %cst = arith.constant dense<0.000000e+00> : vector<8x32xf32>
    %2 = tpu.matmul %0, %1, %cst {dimension_numbers = #tpu.dot_dimension_numbers<[1], [0], [0], [1], [0, 0, 1, 1], [], []>} : vector<8x16xf32>, vector<16x32xf32>, vector<8x32xf32> -> vector<8x32xf32>
    %c0_3 = arith.constant 0 : index
    %c0_4 = arith.constant 0 : index
    %3 = vector.load %arg3[%c0_3, %c0_4] : memref<1x32xf32, #tpu.memory_space<vmem>>, vector<1x32xf32>
    %4 = vector.broadcast %3 : vector<1x32xf32> to vector<8x32xf32>
    %5 = arith.addf %2, %4 : vector<8x32xf32>
    %cst_5 = arith.constant 0.000000e+00 : f32
    %6 = vector.broadcast %cst_5 : f32 to vector<8x32xf32>
    %7 = arith.maximumf %5, %6 : vector<8x32xf32>
    %c0_6 = arith.constant 0 : index
    %c0_7 = arith.constant 0 : index
    %8 = vector.load %arg4[%c0_6, %c0_7] : memref<32x32xf32, #tpu.memory_space<vmem>>, vector<32x32xf32>
    %cst_8 = arith.constant dense<0.000000e+00> : vector<8x32xf32>
    %9 = tpu.matmul %7, %8, %cst_8 {dimension_numbers = #tpu.dot_dimension_numbers<[1], [0], [0], [1], [0, 0, 1, 1], [], []>} : vector<8x32xf32>, vector<32x32xf32>, vector<8x32xf32> -> vector<8x32xf32>
    %c0_9 = arith.constant 0 : index
    %c0_10 = arith.constant 0 : index
    %10 = vector.load %arg5[%c0_9, %c0_10] : memref<1x32xf32, #tpu.memory_space<vmem>>, vector<1x32xf32>
    %11 = vector.broadcast %10 : vector<1x32xf32> to vector<8x32xf32>
    %12 = arith.addf %9, %11 : vector<8x32xf32>
    %cst_11 = arith.constant 0.000000e+00 : f32
    %13 = vector.broadcast %cst_11 : f32 to vector<8x32xf32>
    %14 = arith.maximumf %12, %13 : vector<8x32xf32>
    %c0_12 = arith.constant 0 : index
    %c0_13 = arith.constant 0 : index
    %15 = vector.load %arg6[%c0_12, %c0_13] : memref<32x8xf32, #tpu.memory_space<vmem>>, vector<32x8xf32>
    %cst_14 = arith.constant dense<0.000000e+00> : vector<8x8xf32>
    %16 = tpu.matmul %14, %15, %cst_14 {dimension_numbers = #tpu.dot_dimension_numbers<[1], [0], [0], [1], [0, 0, 1, 1], [], []>} : vector<8x32xf32>, vector<32x8xf32>, vector<8x8xf32> -> vector<8x8xf32>
    %c0_15 = arith.constant 0 : index
    %c0_16 = arith.constant 0 : index
    %17 = vector.load %arg7[%c0_15, %c0_16] : memref<1x8xf32, #tpu.memory_space<vmem>>, vector<1x8xf32>
    %18 = vector.broadcast %17 : vector<1x8xf32> to vector<8x8xf32>
    %19 = arith.addf %16, %18 : vector<8x8xf32>
    %20 = math.tanh %19 : vector<8x8xf32>
    %cst_17 = arith.constant 0.000000e+00 : f32
    %21 = vector.broadcast %cst_17 : f32 to vector<8x8xf32>
    %22 = arith.maximumf %19, %21 : vector<8x8xf32>
    %23 = math.absf %19 : vector<8x8xf32>
    %cst_18 = arith.constant 0.000000e+00 : f32
    %24 = vector.broadcast %cst_18 : f32 to vector<8x8xf32>
    %25 = arith.subf %24, %23 : vector<8x8xf32>
    %26 = math.exp %25 : vector<8x8xf32>
    %27 = math.log1p %26 : vector<8x8xf32>
    %28 = arith.addf %22, %27 : vector<8x8xf32>
    %29 = tpu.iota {dimensions = array<i32: 1>} : vector<8x8xi32>
    %c4_i32 = arith.constant 4 : i32
    %30 = vector.broadcast %c4_i32 : i32 to vector<8x8xi32>
    %31 = arith.cmpi slt, %29, %30 : vector<8x8xi32>
    %32 = arith.select %31, %20, %28 : vector<8x8xi1>, vector<8x8xf32>
    %c0_19 = arith.constant 0 : index
    %c0_20 = arith.constant 0 : index
    %33 = vector.load %arg8[%c0_19, %c0_20] : memref<8x8xf32, #tpu.memory_space<vmem>>, vector<8x8xf32>
    tpu.vector_store %arg8[%c0_19, %c0_20], %32 {strides = array<i32>} : memref<8x8xf32, #tpu.memory_space<vmem>>, vector<8x8xf32>,
    return
  }
  func.func @transform_0(%arg0: i32) -> (i32, i32) {
    %c0_i32 = arith.constant 0 : i32
    %c0_i32_0 = arith.constant 0 : i32
    return %arg0, %c0_i32 : i32, i32
  }
  func.func @transform_1(%arg0: i32) -> (i32, i32) {
    %c0_i32 = arith.constant 0 : i32
    %c0_i32_0 = arith.constant 0 : i32
    %c0_i32_1 = arith.constant 0 : i32
    return %c0_i32, %c0_i32_0 : i32, i32
  }
  func.func @transform_2(%arg0: i32) -> (i32, i32) {
    %c0_i32 = arith.constant 0 : i32
    %c0_i32_0 = arith.constant 0 : i32
    %c0_i32_1 = arith.constant 0 : i32
    return %c0_i32, %c0_i32_0 : i32, i32
  }
  func.func @transform_3(%arg0: i32) -> (i32, i32) {
    %c0_i32 = arith.constant 0 : i32
    %c0_i32_0 = arith.constant 0 : i32
    %c0_i32_1 = arith.constant 0 : i32
    return %c0_i32, %c0_i32_0 : i32, i32
  }
  func.func @transform_4(%arg0: i32) -> (i32, i32) {
    %c0_i32 = arith.constant 0 : i32
    %c0_i32_0 = arith.constant 0 : i32
    %c0_i32_1 = arith.constant 0 : i32
    return %c0_i32, %c0_i32_0 : i32, i32
  }
  func.func @transform_5(%arg0: i32) -> (i32, i32) {
    %c0_i32 = arith.constant 0 : i32
    %c0_i32_0 = arith.constant 0 : i32
    %c0_i32_1 = arith.constant 0 : i32
    return %c0_i32, %c0_i32_0 : i32, i32
  }
  func.func @transform_6(%arg0: i32) -> (i32, i32) {
    %c0_i32 = arith.constant 0 : i32
    %c0_i32_0 = arith.constant 0 : i32
    %c0_i32_1 = arith.constant 0 : i32
    return %c0_i32, %c0_i32_0 : i32, i32
  }
  func.func @transform_7(%arg0: i32) -> (i32, i32) {
    %c0_i32 = arith.constant 0 : i32
    %c0_i32_0 = arith.constant 0 : i32
    return %arg0, %c0_i32 : i32, i32
  }
}

</mosaic_0001>

<bundles_post_ra>
// kernel: actor_forward.1
= control target key start
LH: loop header
LB: loop body
LE: loop exit
PB: predicated region body
PF: predicated region fallthrough
CT: control target
= control target key end

     0   :  { %12 = vsyncpa [#allocation3], 0  ;;  %s969_s0 = inlined_call_operand.vmem [shape: f32[16,16], index: 0, kind: input, shape index: {}]   ;;  %s970_s1 = inlined_call_operand.vmem [shape: f32[16,32], index: 1, kind: input, shape index: {}]   ;;  %s971_s2 = inlined_call_operand.hbm [shape: f32[1,32], index: 2, kind: input, shape index: {}]   ;;  %s972_s3 = inlined_call_operand.vmem [shape: f32[32,32], index: 3, kind: input, shape index: {}]   ;;  %s973_s4 = inlined_call_operand.hbm [shape: f32[1,32], index: 4, kind: input, shape index: {}]   ;;  %s974_s5 = inlined_call_operand.vmem [shape: f32[32,8], index: 5, kind: input, shape index: {}]   ;;  %s975_s6 = inlined_call_operand.vmem [shape: f32[1,8], index: 6, kind: input, shape index: {}]   ;;  %s976_s7 = inlined_call_operand.vmem [shape: f32[16,8], index: 7, kind: output, shape index: {}]  }
   0x1   :  { %13 = vsyncpa [#allocation5], 0  ;;  %s862_s24 = smov 0  }
   0x2 LB: > { %s868_s25 = sadd.s32 4294967295, %s816_s24   ;;  %p654_p0 = scmp.ge.s32.totalorder %s816_s24, 1  ;;  %s816_s24 = sphi %s862_s24, %s19_s24  }
   0x3   : > { %p202_p1 = scmp.lt.s32.totalorder %s816_s24, 3  ;;  %p977_p2 = scmp.eq.s32.totalorder %s868_s25, 0 }
   0x4   : > { %s818_s27 = smov [#allocation2]   ;;  %s819_s29 = smov [#allocation4]  }
   0x5   : > { %p873_p3 = pnand %p654_p0, %p202_p1  ;;  %s218_s28 = sshll.u32 %s818_s27, 4  ;;  %s219_s28 = int_to_ptr.vmem [resolvable:$true] %s218_s28 }
   0x6   : > { %s232_s30 = sshll.u32 %s819_s29, 4  ;;  %s761_s9 = scalar_lea.vmem %s219_s28, 16  ;;  %s233_s30 = int_to_ptr.vmem [resolvable:$true] %s232_s30 }
   0x7   : > { %p721_p4 = pneg %p873_p3  ;;  %p762_p7 = scmp.ne.s32.totalorder %s219_s28, %s761_s9 }
   0x8   : > { %s768_s10 = scalar_lea.vmem %s219_s28, 32  ;;  %p769_p10 = scmp.lt.s32.totalorder %s219_s28, %s219_s28 }
   0x9   : > { %p881_p5 = pnand %p977_p2, %p721_p4  ;;  %p770_p11 = scmp.lt.s32.totalorder %s768_s10, %s761_s9 }
   0xb   : > { %p752_p6 = pneg %p881_p5  ;;  %p771_p12 = por %p770_p11, %p769_p10 }
   0xd   : > { %p764_p8 = pnand %p762_p7, %p752_p6 }
   0xf   : > { %p765_p9 = pneg %p764_p8 }
  0x11   : > { %p772_p13 = pnand %p771_p12, %p765_p9 }
  0x13   : > { %775 = shalt.err (!%p772_p13)
}
  0x14   : > { %724 = dma.hbm_to_vmem [thread:$0]  (!%p881_p5), %s971_s2, 16, %s219_s28, [#allocation3]  }
  0x15   : > { %s787_s13 = scalar_lea.vmem %s233_s30, 16  ;;  %s794_s14 = scalar_lea.vmem %s233_s30, 32 }
  0x16   : > { %p788_p0 = scmp.ne.s32.totalorder %s233_s30, %s787_s13  ;;  %p795_p7 = scmp.lt.s32.totalorder %s233_s30, %s233_s30 }
  0x17   : > { %p796_p8 = scmp.lt.s32.totalorder %s794_s14, %s787_s13 }
  0x18   : > { %p790_p1 = pnand %p788_p0, %p752_p6 }
  0x19   : > { %p797_p2 = por %p796_p8, %p795_p7 }
  0x1a   : > { %p791_p4 = pneg %p790_p1 }
  0x1c   : > { %p798_p10 = pnand %p797_p2, %p791_p4 }
  0x1e   : > { %801 = shalt.err (!%p798_p10)
}
  0x1f   : > { %727 = dma.hbm_to_vmem [thread:$0]  (!%p881_p5), %s973_s4, 16, %s233_s30, [#allocation5]  }
  0x20   : > { %258 = sbr.rel (%p873_p3) target bundleno = 680 (0x2a8), region = 48  ;;  %p980_p9 = scmp.eq.s32.totalorder (!%p873_p3), %s868_s25, 0 }
  0x25   : > { %807 = dma.done.wait (%p980_p9), [#allocation3], 16   ;;  %p981_p6 = pmov %p980_p9 }
  0x27   : > { %809 = vsyncadd (%p981_p6), [#allocation3], 4294967280  ;;  %p982_p11 = pmov %p981_p6 }
  0x28   : > { %p983_p2 = pmov %p981_p6 }
  0x29   : > { %811 = dma.done.wait (%p982_p11), [#allocation5], 16  }
  0x2a   : > { %813 = vsyncadd (%p983_p2), [#allocation5], 4294967280  ;;  %p292_p12 = scmp.lt.s32.totalorder %s868_s25, 1  ;;  %v820_v0 = vmov 0.0   ;;  %vm821_vm0 = vmmov 0   ;;  %v302_v1 = vld [vmem:[%s970_s1 + $0x8] sm:$0xff]  ;;  %v571_v32 = vlaneseq }
  0x2b   : > { %684 = vmatprep.subr.mxu0 %v820_v0  ;;  %688 = vmatprep.mubr.msk.f32.mxu0 %vm821_vm0, %v820_v0  ;;  %v301_v2 = vld [vmem:[%s970_s1] sm:$0xff]  ;;  %vm310_vm1 = vcmask 130048   ;;  %v388_v4 = vld [vmem:[%s972_s3 + $0x18] sm:$0xff]  ;;  %v387_v5 = vld [vmem:[%s972_s3 + $0x10] sm:$0xff]  ;;  %vm396_vm2 = vcmask 261120   ;;  %vm575_vm5 = vcmask 64512  }
  0x2c   : > { %s985_s25 = smov (!%p292_p12, %s868_s25), 1  ;;  %691 = vmatprep.subr.mxu1 %v820_v0  ;;  %699 = vmatprep.mubr.msk.f32.mxu1 %vm821_vm0, %v820_v0  ;;  %v386_v6 = vld [vmem:[%s972_s3 + $0x8] sm:$0xff]  ;;  %v385_v7 = vld [vmem:[%s972_s3] sm:$0xff]  ;;  %v474_v8 = vld [vmem:[%s974_s5 + $0x18] sm:$0xff]  ;;  %v572_v35 = vand.u32 127, %v571_v32 }
  0x2d   : > { %s661_s17 = sshll.u32 %s985_s25, 3  ;;  %685 = vmatpush3.msra.mxu0 %v302_v1  ;;  %692 = vmatpush3.msra.mxu1 %v388_v4  ;;  %v663_v9 = vld [vmem:[#allocation2] ss:$0 sm:$0xff]  ;;  %v473_v14 = vld [vmem:[%s974_s5 + $0x10] sm:$0xff]  ;;  %v472_v15 = vld [vmem:[%s974_s5 + $0x8] sm:$0xff] }
  0x2e   : > { %s295_s20 = scalar_lea.vmem %s969_s0, %s661_s17  ;;  %686 = vmatprep.subr.mxu0 %v820_v0  ;;  %693 = vmatprep.subr.mxu1 %v820_v0  ;;  %v471_v16 = vld [vmem:[%s974_s5] sm:$0xff]  ;;  %vm573_vm4 = vcmp.lt.s32.totalorder %v572_v35, 4  ;;  %s299_s27 = scalar_lea.vmem %s976_s7, %s661_s17 }
  0x2f   : > { %v300_v3 = vld [vmem:[%s295_s20] sm:$0xff]  ;;  %687 = vmatpush3.msra.mxu0 %v301_v2  ;;  %694 = vmatpush3.msra.mxu1 %v387_v5 }
  0x30   : > { %689 = vmatmul.mubr.msk.f32.vlgmr.msra.gmra.mxu0 %vm310_vm1, %v300_v3  ;;  %702 = vmatprep.subr.mxu0 %v820_v0  ;;  %v665_v17 = vld [vmem:[#allocation4] ss:$0 sm:$0xff]  ;;  %v667_v22 = vld [vmem:[%s975_s6] ss:$0 sm:$0xff] }
  0x31   : > { %710 = vmatprep.mubr.msk.f32.mxu0 %vm821_vm0, %v820_v0  ;;  %695 = vmatprep.subr.mxu1 %v820_v0 }
  0x32   : > { %696 = vmatpush3.msra.mxu1 %v386_v6  ;;  %703 = vmatpush3.msra.mxu0 %v474_v8 }
  0x33   : > { %697 = vmatprep.subr.mxu1 %v820_v0  ;;  %704 = vmatprep.subr.mxu0 %v820_v0 }
  0x34   : > { %698 = vmatpush3.msra.mxu1 %v385_v7  ;;  %705 = vmatpush3.msra.mxu0 %v473_v14 }
  0x35   : > { %706 = vmatprep.subr.mxu0 %v820_v0 }
  0x36   : > { %707 = vmatpush3.msra.mxu0 %v472_v15 }
  0x37   : > { %708 = vmatprep.subr.mxu0 %v820_v0 }
  0x38   : > { %709 = vmatpush3.msra.mxu0 %v471_v16 }
  0xf0   : > { %v380_v10 = vpop.f32.mrf.mxu0 }
  0xf1   : > { %v381_v11 = vadd.f32 %v663_v9, %v380_v10 }
  0xf2   : > { %v690_v12 = vpop.f32.mrf.mxu0 }
  0xf3   : > { %v384_v13 = vmax.f32 %v381_v11, 0.0 }
  0xf5   : > { %700 = vmatmul.mubr.msk.f32.vlgmr.msra.gmra.mxu1 %vm396_vm2, %v384_v13 }
 0x1b5   : > { %v466_v18 = vpop.f32.mrf.mxu1 }
 0x1b6   : > { %v467_v19 = vadd.f32 %v665_v17, %v466_v18 }
 0x1b7   : > { %v701_v20 = vpop.f32.mrf.mxu1 }
 0x1b8   : > { %v470_v21 = vmax.f32 %v467_v19, 0.0 }
 0x1ba   : > { %711 = vmatmul.mubr.msk.f32.vlgmr.msra.gmra.mxu0 %vm396_vm2, %v470_v21 }
 0x27a   : > { %v551_v23 = vpop.f32.mrf.mxu0 }
 0x27b   : > { %v552_v24 = vadd.f32 %v667_v22, %v551_v23 }
 0x27c   : > { %v712_v25 = vpop.f32.mrf.mxu0 }
 0x27d   : > { %v557_v26 = vand.u32 2147483647, %v552_v24  ;;  %v556_v39 = vmax.f32 %v552_v24, 0.0 }
 0x27f   : > { %v558_v27 = vsub.f32 0.0, %v557_v26 }
 0x281   : > { %v559_v28 = vmul.f32 1.442695, %v558_v27 }
 0x283   : > { %744 = vpow2.f32 %v559_v28 }
 0x290   : > { %v745_v29 = vpop.eup %744 }
 0x291   : > { %v561_v30 = vadd.f32 1.0, %v745_v29  ;;  %v564_v31 = vmul.f32 -0.5, %v745_v29  ;;  %v567_v34 = vand.u32 2147483647, %v745_v29 }
 0x293   : > { %746 = vlog2.f32 %v561_v30  ;;  %v565_v33 = vadd.f32 1.0, %v564_v31  ;;  %vm568_vm3 = vcmp.lt.f32.partialorder %v567_v34, 0.0004427343 }
 0x294   : > { %748 = vtanh.f32 %v552_v24 }
 0x295   : > { %v566_v38 = vmul.f32 %v745_v29, %v565_v33 }
 0x2a0   : > { %v747_v36 = vpop.eup %746 }
 0x2a1   : > { %v563_v37 = vmul.f32 0.6931472, %v747_v36  ;;  %v749_v42 = vpop.eup %748 }
 0x2a3   : > { %v569_v40 = vsel %vm568_vm3, %v566_v38, %v563_v37 }
 0x2a4   : > { %v570_v41 = vadd.f32 %v569_v40, %v556_v39 }
 0x2a6   : > { %v574_v43 = vsel %vm573_vm4, %v749_v42, %v570_v41 }
 0x2a7   : > { %576 = vst.msk [vmem:[%s299_s27] sm:$0xff] %vm575_vm5, %v574_v43 }
 0x2a8 PF: > { %s19_s24 = sadd.s32 1, %s816_s24  }
 0x2a9   : > { %p16_p3 = scmp.ge.s32.totalorder %s19_s24, 4  }
 0x2ab   :  { %18 = sbr.rel (!%p16_p3) target bundleno = 2 (0x2), region = 87 }
 0x2b0   :  { %596 = vsyncpa [#allocation3], 1 }
 0x2b1   :  { %598 = vsyncpa [#allocation3 + $0x1], 1 }
 0x2b2   :  { %599 = vsyncpa [#allocation5], 1 }

</bundles_post_ra>
